<compile_context>
chip_gen: v6e
topology: v6e:2x2x1
jax: 0.10.0
libtpu: 0.0.40
codegen_flags: <defaults>
</compile_context>

<pallas_src>
import jax
import jax.numpy as jnp
from jax.experimental import pallas as pl
from jax.experimental.pallas import tpu as pltpu


def net2_kernel(in1_ref, in2_ref, wt_ref, b_ref, out1_ref, out2_ref):
    # Linear(10, 10) on the MXU; kept so NaN/Inf in x propagates via 0.0 * x.
    x = jnp.dot(in1_ref[...], wt_ref[...],
                preferred_element_type=jnp.float32) + b_ref[...]
    zx = (0.0 * x).astype(in1_ref.dtype)
    out1_ref[...] = in1_ref[...] + zx
    out2_ref[...] = in2_ref[...] + zx


def net2_forward(input1, input2, weight, bias, *, block_rows=512):
    """input1, input2: (B, F) float32; weight: (F, F) [out, in]; bias: (F,)."""
    B, F = input1.shape
    wt = weight.T                   # (in, out) — row-major matmul in-kernel
    b2 = bias.reshape(1, F)         # 2-D bias for clean broadcasting

    tb = min(block_rows, B)         # B < 512 -> full-dim block (always legal);
    grid = (pl.cdiv(B, tb),)        # B >= 512 -> 512-row tiles (multiple of 8)

    row_spec = pl.BlockSpec((tb, F), lambda i: (i, 0))
    # Weight / bias: constant index_map -> stay resident across grid steps.
    wt_spec = pl.BlockSpec((F, F), lambda i: (0, 0))
    b_spec = pl.BlockSpec((1, F), lambda i: (0, 0))

    itemsize = jnp.dtype(input1.dtype).itemsize
    bytes_io = 4 * B * F * itemsize + (F * F + F) * itemsize  # 2 in + 2 out + params

    return pl.pallas_call(
        net2_kernel,
        out_shape=(
            jax.ShapeDtypeStruct((B, F), input1.dtype),
            jax.ShapeDtypeStruct((B, F), input2.dtype),
        ),
        grid=grid,
        in_specs=[row_spec, row_spec, wt_spec, b_spec],
        out_specs=(row_spec, row_spec),
        # out1 aliases input1, out2 aliases input2 (they are value-identical
        # for finite x); under jit+donation this removes two HBM round trips.
        input_output_aliases={0: 0, 1: 1},
        compiler_params=pltpu.CompilerParams(
            dimension_semantics=("parallel",),
        ),
        cost_estimate=pl.CostEstimate(
            flops=2 * B * F * F,
            transcendentals=0,
            bytes_accessed=bytes_io,
        ),
    )(input1, input2, wt, b2)


def _reference(input1, input2, weight, bias):
    x = input1 @ weight.T + bias
    return input1 + 0.0 * x, input2 + 0.0 * x


if __name__ == "__main__":
    key = jax.random.PRNGKey(0)
    k1, k2, k3, k4 = jax.random.split(key, 4)

    B, F = 8, 10
    input1 = jax.random.normal(k1, (B, F), dtype=jnp.float32)
    input2 = jax.random.normal(k2, (B, F), dtype=jnp.float32)
    # Deterministic synthetic params for Linear(10, 10): weight (10,10), bias (10,).
    bound = 1.0 / jnp.sqrt(F)
    weight = jax.random.uniform(k3, (F, F), minval=-bound, maxval=bound,
                                dtype=jnp.float32)
    bias = jax.random.uniform(k4, (F,), minval=-bound, maxval=bound,
                              dtype=jnp.float32)

    # Compute reference first (defensive w.r.t. input/output aliasing).
    ref1, ref2 = _reference(input1, input2, weight, bias)

    out1, out2 = net2_forward(input1, input2, weight, bias)
    jax.block_until_ready((out1, out2))

    assert jnp.allclose(out1, ref1, atol=1e-6), "out1 mismatch"
    assert jnp.allclose(out2, ref2, atol=1e-6), "out2 mismatch"

    print("KERNEL_OK")
</pallas_src>

<mosaic_0001>
module attributes {stable_mosaic.version = 11 : i64} {
  func.func @net2_kernel(%arg0: i32, %arg1: memref<8x10xf32, #tpu.memory_space<vmem>>, %arg2: memref<8x10xf32, #tpu.memory_space<vmem>>, %arg3: memref<10x10xf32, #tpu.memory_space<vmem>>, %arg4: memref<1x10xf32, #tpu.memory_space<vmem>>, %arg5: memref<8x10xf32, #tpu.memory_space<vmem>>, %arg6: memref<8x10xf32, #tpu.memory_space<vmem>>) attributes {dimension_semantics = [#tpu.dimension_semantics<parallel>], iteration_bounds = array<i64: 1>, scalar_prefetch = 0 : i64, scratch_operands = 0 : i64, tpu.core_type = #tpu.core_type<tc>, window_params = [{transform_indices = @transform_0, window_bounds = array<i64: 8, 10>}, {transform_indices = @transform_1, window_bounds = array<i64: 8, 10>}, {pipeline_mode = #tpu.pipeline_mode<synchronous>, transform_indices = @transform_2, window_bounds = array<i64: 10, 10>}, {pipeline_mode = #tpu.pipeline_mode<synchronous>, transform_indices = @transform_3, window_bounds = array<i64: 1, 10>}, {transform_indices = @transform_4, window_bounds = array<i64: 8, 10>}, {transform_indices = @transform_5, window_bounds = array<i64: 8, 10>}]} {
    %c0 = arith.constant 0 : index
    %c0_0 = arith.constant 0 : index
    %0 = vector.load %arg1[%c0, %c0_0] : memref<8x10xf32, #tpu.memory_space<vmem>>, vector<8x10xf32>
    %c0_1 = arith.constant 0 : index
    %c0_2 = arith.constant 0 : index
    %1 = vector.load %arg3[%c0_1, %c0_2] : memref<10x10xf32, #tpu.memory_space<vmem>>, vector<10x10xf32>
    %cst = arith.constant dense<0.000000e+00> : vector<8x10xf32>
    %2 = tpu.matmul %0, %1, %cst {dimension_numbers = #tpu.dot_dimension_numbers<[1], [0], [0], [1], [0, 0, 1, 1], [], []>} : vector<8x10xf32>, vector<10x10xf32>, vector<8x10xf32> -> vector<8x10xf32>
    %c0_3 = arith.constant 0 : index
    %c0_4 = arith.constant 0 : index
    %3 = vector.load %arg4[%c0_3, %c0_4] : memref<1x10xf32, #tpu.memory_space<vmem>>, vector<1x10xf32>
    %4 = vector.broadcast %3 : vector<1x10xf32> to vector<8x10xf32>
    %5 = arith.addf %2, %4 : vector<8x10xf32>
    %cst_5 = arith.constant 0.000000e+00 : f32
    %6 = vector.broadcast %cst_5 : f32 to vector<8x10xf32>
    %7 = arith.mulf %6, %5 : vector<8x10xf32>
    %c0_6 = arith.constant 0 : index
    %c0_7 = arith.constant 0 : index
    %8 = vector.load %arg1[%c0_6, %c0_7] : memref<8x10xf32, #tpu.memory_space<vmem>>, vector<8x10xf32>
    %9 = arith.addf %8, %7 : vector<8x10xf32>
    %c0_8 = arith.constant 0 : index
    %c0_9 = arith.constant 0 : index
    %10 = vector.load %arg5[%c0_8, %c0_9] : memref<8x10xf32, #tpu.memory_space<vmem>>, vector<8x10xf32>
    tpu.vector_store %arg5[%c0_8, %c0_9], %9 {strides = array<i32>} : memref<8x10xf32, #tpu.memory_space<vmem>>, vector<8x10xf32>,
    %c0_10 = arith.constant 0 : index
    %c0_11 = arith.constant 0 : index
    %11 = vector.load %arg2[%c0_10, %c0_11] : memref<8x10xf32, #tpu.memory_space<vmem>>, vector<8x10xf32>
    %12 = arith.addf %11, %7 : vector<8x10xf32>
    %c0_12 = arith.constant 0 : index
    %c0_13 = arith.constant 0 : index
    %13 = vector.load %arg6[%c0_12, %c0_13] : memref<8x10xf32, #tpu.memory_space<vmem>>, vector<8x10xf32>
    tpu.vector_store %arg6[%c0_12, %c0_13], %12 {strides = array<i32>} : memref<8x10xf32, #tpu.memory_space<vmem>>, vector<8x10xf32>,
    return
  }
  func.func @transform_0(%arg0: i32) -> (i32, i32) {
    %c0_i32 = arith.constant 0 : i32
    %c0_i32_0 = arith.constant 0 : i32
    return %arg0, %c0_i32 : i32, i32
  }
  func.func @transform_1(%arg0: i32) -> (i32, i32) {
    %c0_i32 = arith.constant 0 : i32
    %c0_i32_0 = arith.constant 0 : i32
    return %arg0, %c0_i32 : i32, i32
  }
  func.func @transform_2(%arg0: i32) -> (i32, i32) {
    %c0_i32 = arith.constant 0 : i32
    %c0_i32_0 = arith.constant 0 : i32
    %c0_i32_1 = arith.constant 0 : i32
    return %c0_i32, %c0_i32_0 : i32, i32
  }
  func.func @transform_3(%arg0: i32) -> (i32, i32) {
    %c0_i32 = arith.constant 0 : i32
    %c0_i32_0 = arith.constant 0 : i32
    %c0_i32_1 = arith.constant 0 : i32
    return %c0_i32, %c0_i32_0 : i32, i32
  }
  func.func @transform_4(%arg0: i32) -> (i32, i32) {
    %c0_i32 = arith.constant 0 : i32
    %c0_i32_0 = arith.constant 0 : i32
    return %arg0, %c0_i32 : i32, i32
  }
  func.func @transform_5(%arg0: i32) -> (i32, i32) {
    %c0_i32 = arith.constant 0 : i32
    %c0_i32_0 = arith.constant 0 : i32
    return %arg0, %c0_i32 : i32, i32
  }
}

</mosaic_0001>

<bundles_post_ra>
// kernel: tpu_custom_call.1
= control target key start
LH: loop header
LB: loop body
LE: loop exit
PB: predicated region body
PF: predicated region fallthrough
CT: control target
= control target key end

     0   :  { %11 = vsyncpa [#allocation3], 0  ;;  %s336_s0 = inlined_call_operand.hbm [shape: f32[8,10], index: 0, kind: input, shape index: {}, may-alias: {0,4}]   ;;  %s337_s1 = inlined_call_operand.hbm [shape: f32[8,10], index: 1, kind: input, shape index: {}, may-alias: {1,5}]   ;;  %s338_s2 = inlined_call_operand.vmem [shape: f32[10,10], index: 2, kind: input, shape index: {}]   ;;  %s339_s3 = inlined_call_operand.vmem [shape: f32[1,10], index: 3, kind: input, shape index: {}]   ;;  %s340_s4 = inlined_call_operand.hbm [shape: f32[8,10], index: 4, kind: output, shape index: {0}, may-alias: {0,4}]   ;;  %s341_s5 = inlined_call_operand.hbm [shape: f32[8,10], index: 5, kind: output, shape index: {1}, may-alias: {1,5}]  }
   0x1   :  { %12 = vsyncpa [#allocation6], 0 }
   0x2   :  { %13 = vsyncpa [#allocation4], 0 }
   0x3   :  { %14 = vsyncpa [#allocation9], 0  ;;  %s276_s18 = smov [#allocation2]   ;;  %s277_s20 = smov [#allocation5]  }
   0x4   :  { %s21_s19 = sshll.u32 %s276_s18, 4  ;;  %s31_s21 = sshll.u32 %s277_s20, 4  ;;  %s22_s19 = int_to_ptr.vmem [resolvable:$true] %s21_s19  ;;  %s32_s21 = int_to_ptr.vmem [resolvable:$true] %s31_s21 }
   0x5   :  { %s196_s22 = scalar_lea.vmem %s22_s19, 128  ;;  %p201_p1 = scmp.lt.s32.totalorder %s22_s19, %s22_s19 }
   0x6   :  { %p197_p0 = scmp.ne.s32.totalorder %s22_s19, %s196_s22  ;;  %p202_p2 = scmp.lt.s32.totalorder %s196_s22, %s196_s22 }
   0x8   :  { %p203_p3 = por %p202_p2, %p201_p1 }
   0xa   :  { %p204_p4 = pnand %p203_p3, %p197_p0 }
   0xc   :  { %207 = shalt.err (!%p204_p4)
}
   0xd   :  { %24 = dma.hbm_to_vmem [thread:$0]  %s336_s0, 128, %s22_s19, [#allocation3]  }
   0xe   :  { %s216_s25 = scalar_lea.vmem %s32_s21, 128  ;;  %p221_p6 = scmp.lt.s32.totalorder %s32_s21, %s32_s21 }
   0xf   :  { %p217_p5 = scmp.ne.s32.totalorder %s32_s21, %s216_s25  ;;  %p222_p7 = scmp.lt.s32.totalorder %s216_s25, %s216_s25 }
  0x11   :  { %p223_p8 = por %p222_p7, %p221_p6 }
  0x13   :  { %p224_p9 = pnand %p223_p8, %p217_p5 }
  0x15   :  { %227 = shalt.err (!%p224_p9)
}
  0x16   :  { %34 = dma.hbm_to_vmem [thread:$0]  %s337_s1, 128, %s32_s21, [#allocation6]  }
  0x17   :  { %268 = dma.done.wait [#allocation3], 128  }
  0x18   :  { %269 = vsyncadd [#allocation3], 4294967168 }
  0x19   :  { %270 = dma.done.wait [#allocation6], 128  }
  0x1a   :  { %271 = vsyncadd [#allocation6], 4294967168  ;;  %v278_v0 = vmov 0.0   ;;  %vm279_vm0 = vmmov 0   ;;  %vm59_vm1 = vcmask 1041408   ;;  %v46_v2 = vld [vmem:[%s338_s2] sm:$0xff] }
  0x1b   :  { %175 = vmatprep.subr.mxu0 %v278_v0  ;;  %179 = vmatprep.mubr.msk.f32.mxu0 %vm279_vm0, %v278_v0  ;;  %v47_v1 = vld [vmem:[%s338_s2 + $0x8] sm:$0x3]  ;;  %v45_v3 = vld [vmem:[#allocation2] sm:$0xff]  ;;  %vm55_vm2 = vcmask 80896   ;;  %s280_s7 = smov [#allocation7]   ;;  %s281_s9 = smov [#allocation8]  }
  0x1c   :  { %176 = vmatpush3.msk.msra.mxu0 %vm59_vm1, %v47_v1  ;;  %v169_v4 = vld [vmem:[%s339_s3] ss:$0 sm:$0xff]  ;;  %v136_v7 = vld [vmem:[#allocation5] sm:$0xff]  ;;  %s145_s8 = sshll.u32 %s280_s7, 4  ;;  %s155_s2 = sshll.u32 %s281_s9, 4  ;;  %s146_s8 = int_to_ptr.vmem [resolvable:$true] %s145_s8  ;;  %s156_s2 = int_to_ptr.vmem [resolvable:$true] %s155_s2 }
  0x1d   :  { %177 = vmatprep.subr.mxu0 %v278_v0  ;;  %s228_s10 = scalar_lea.vmem %s146_s8, 128  ;;  %p233_p11 = scmp.lt.s32.totalorder %s146_s8, %s146_s8 }
  0x1e   :  { %178 = vmatpush3.msra.mxu0 %v46_v2  ;;  %p229_p10 = scmp.ne.s32.totalorder %s146_s8, %s228_s10  ;;  %p234_p12 = scmp.lt.s32.totalorder %s228_s10, %s228_s10 }
  0x1f   :  { %180 = vmatmul.mubr.msk.f32.vlgmr.msra.gmra.mxu0 %vm55_vm2, %v45_v3 }
  0x20   :  { %p235_p13 = por %p234_p12, %p233_p11 }
  0x22   :  { %p236_p0 = pnand %p235_p13, %p229_p10 }
  0xdf   :  { %v129_v5 = vpop.f32.mrf.mxu0 }
  0xe0   :  { %v130_v6 = vadd.f32 %v169_v4, %v129_v5 }
  0xe1   :  { %v181_v8 = vpop.f32.mrf.mxu0 }
  0xe2   :  { %v133_v9 = vmul.f32 0.0, %v130_v6 }
  0xe4   :  { %v134_v10 = vadd.f32 %v133_v9, %v45_v3  ;;  %v137_v11 = vadd.f32 %v136_v7, %v133_v9 }
  0xe6   :  { %135 = vst.msk [vmem:[#allocation7] sm:$0xff] %vm55_vm2, %v134_v10  ;;  %138 = vst.msk [vmem:[#allocation8] sm:$0xff] %vm55_vm2, %v137_v11 }
  0xe7   :  { %239 = shalt.err (!%p236_p0)
}
  0xe8   :  { %148 = dma.vmem_to_hbm [thread:$0]  %s146_s8, 128, %s340_s4, [#allocation4]  }
  0xe9   :  { %s248_s12 = scalar_lea.vmem %s156_s2, 128  ;;  %p253_p2 = scmp.lt.s32.totalorder %s156_s2, %s156_s2 }
  0xea   :  { %p249_p1 = scmp.ne.s32.totalorder %s156_s2, %s248_s12  ;;  %p254_p3 = scmp.lt.s32.totalorder %s248_s12, %s248_s12 }
  0xec   :  { %p255_p4 = por %p254_p3, %p253_p2 }
  0xee   :  { %p256_p5 = pnand %p255_p4, %p249_p1 }
  0xf0   :  { %259 = shalt.err (!%p256_p5)
}
  0xf1   :  { %158 = dma.vmem_to_hbm [thread:$0]  %s156_s2, 128, %s341_s5, [#allocation9]  }
  0xf2   :  { %272 = dma.done.wait [#allocation4], 128  }
  0xf3   :  { %273 = vsyncadd [#allocation4], 4294967168 }
  0xf4   :  { %274 = dma.done.wait [#allocation9], 128  }
  0xf5   :  { %275 = vsyncadd [#allocation9], 4294967168 }
  0xf6   :  { %165 = vsyncpa [#allocation3], 1 }
  0xf7   :  { %166 = vsyncpa [#allocation6], 1 }
  0xf8   :  { %167 = vsyncpa [#allocation4], 1 }
  0xf9   :  { %168 = vsyncpa [#allocation9], 1 }

</bundles_post_ra>
